<compile_context>
chip_gen: v5e
topology: v5e:2x2
jax: 0.10.0
libtpu: 0.0.40
codegen_flags: <defaults>
</compile_context>

<pallas_src>
import functools

import jax
import jax.numpy as jnp
from jax.experimental import pallas as pl
from jax.experimental.pallas import tpu as pltpu


def _round_up(x, m):
    return ((x + m - 1) // m) * m


def _pick_tile(padded, unit, cap, min_blocks=1):
    """Largest multiple of `unit` that divides `padded`, is <= cap, and leaves
    at least `min_blocks` blocks along the axis."""
    q = padded // unit
    d = min(q, max(cap // unit, 1), max(q // min_blocks, 1))
    while d > 1 and q % d != 0:
        d -= 1
    return max(d, 1) * unit


def _mxu_nt(x_ref, w_ref, compute_dtype):
    # (tm, tk) x (tn, tk) -> (tm, tn): contract the K (last) dim of both
    # operands.  Cast to compute_dtype (bf16 by default) so the MXU runs its
    # native bf16 path; accumulate in f32.
    return jax.lax.dot_general(
        x_ref[...].astype(compute_dtype),
        w_ref[...].astype(compute_dtype),
        dimension_numbers=(((1,), (1,)), ((), ())),
        preferred_element_type=jnp.float32,
    )


def _fc_kernel_f32_out(x_ref, w_ref, b_ref, o_ref, *, compute_dtype):
    # f32 output: the output tile is VMEM-resident across the K axis (its
    # block index is constant along K), so accumulate directly into it.
    k = pl.program_id(2)

    @pl.when(k == 0)
    def _init():
        o_ref[...] = jnp.zeros_like(o_ref)

    o_ref[...] += _mxu_nt(x_ref, w_ref, compute_dtype)

    # Bias add paid once per output tile, not per K step.
    @pl.when(k == pl.num_programs(2) - 1)
    def _finalize():
        o_ref[...] += b_ref[...].astype(jnp.float32)


def _fc_kernel_lowp_out(x_ref, w_ref, b_ref, o_ref, acc_ref, *, compute_dtype):
    # Low-precision (e.g. bf16) output: keep an f32 VMEM accumulator and cast
    # once at the last K step.
    k = pl.program_id(2)

    @pl.when(k == 0)
    def _init():
        acc_ref[...] = jnp.zeros_like(acc_ref)

    acc_ref[...] += _mxu_nt(x_ref, w_ref, compute_dtype)

    @pl.when(k == pl.num_programs(2) - 1)
    def _finalize():
        o_ref[...] = (acc_ref[...] + b_ref[...].astype(jnp.float32)).astype(o_ref.dtype)


def fc_forward(x, weight, bias, *, compute_dtype=jnp.bfloat16,
               max_tm=None, max_tn=None, max_tk=None):
    """y = x @ weight.T + bias  (PyTorch nn.Linear semantics).

    x:      (B, in_features)
    weight: (out_features, in_features)   -- PyTorch layout, never transposed in HBM
    bias:   (out_features,)
    compute_dtype: MXU operand dtype (bf16 default; pass jnp.float32 for
                   strict f32 matmul at ~4-8x MXU cost).
    """
    B, IN = x.shape
    OUT, IN_w = weight.shape
    assert IN == IN_w and bias.shape == (OUT,)
    out_dtype = x.dtype

    # ---- generation-dependent VMEM budget & default tile caps --------------
    phys_vmem = 64 << 20  # conservative (v7x-sized) fallback
    try:
        cap = getattr(pltpu.get_tpu_info(), "vmem_capacity_bytes", None)
        if cap:
            phys_vmem = int(cap)
    except Exception:
        pass
    if phys_vmem >= (128 << 20):      # v5e / v6e: 128 MiB physical VMEM
        vmem_limit = 96 << 20
        dm, dn, dk = 512, 2048, 1024
    else:                             # v7x: 64 MiB physical -> leave headroom
        vmem_limit = 48 << 20
        dm, dn, dk = 512, 1024, 1024
    max_tm = dm if max_tm is None else max_tm
    max_tn = dn if max_tn is None else max_tn
    max_tk = dk if max_tk is None else max_tk

    # ---- minimal aligned extents; tiles are exact divisors of them ---------
    Mp = _round_up(B, 16)       # 16: bf16 sublane packing on the M axis
    Np = _round_up(OUT, 128)    # lane-dense output / weight-sublane axis
    Kp = _round_up(IN, 128)     # lane axis of both x and weight

    tm = _pick_tile(Mp, 16, max_tm)
    tn = _pick_tile(Np, 128, max_tn)
    tk = _pick_tile(Kp, 128, max_tk)

    # v7x megacore: the "parallel" M x N grid needs >= 2 blocks so the second
    # TensorCore gets work; split N when possible (cheap no-op on v5e/v6e).
    if (Mp // tm) * (Np // tn) < 2 and Np // 128 >= 2:
        tn = _pick_tile(Np, 128, max_tn, min_blocks=2)

    # ---- padding: at most one thin 16/128-wide zero block per axis ---------
    xp = x if (Mp == B and Kp == IN) else jnp.pad(x, ((0, Mp - B), (0, Kp - IN)))
    wp = weight if (Np == OUT and Kp == IN) else jnp.pad(
        weight, ((0, Np - OUT), (0, Kp - IN)))
    bp = (bias if Np == OUT else jnp.pad(bias, (0, Np - OUT))).reshape(1, Np)

    grid = (Mp // tm, Np // tn, Kp // tk)
    nk = grid[2]

    f32_out = out_dtype == jnp.float32
    kernel = functools.partial(
        _fc_kernel_f32_out if f32_out else _fc_kernel_lowp_out,
        compute_dtype=compute_dtype)
    scratch = [] if f32_out else [pltpu.VMEM((tm, tn), jnp.float32)]

    # Deeper buffering on the dominant (weight) stream when K is iterated.
    w_spec = pl.BlockSpec((tn, tk), lambda i, j, k: (j, k))
    if nk > 1:
        try:
            w_spec = pl.BlockSpec((tn, tk), lambda i, j, k: (j, k),
                                  pipeline_mode=pl.Buffered(3))
        except (TypeError, AttributeError):
            pass  # older pallas without pipeline_mode: default double buffer

    cost = pl.CostEstimate(
        flops=int(2 * Mp * Np * Kp),
        transcendentals=0,
        bytes_accessed=int(xp.size * xp.dtype.itemsize
                           + wp.size * wp.dtype.itemsize
                           + bp.size * bp.dtype.itemsize
                           + Mp * Np * jnp.dtype(out_dtype).itemsize),
    )

    out = pl.pallas_call(
        kernel,
        out_shape=jax.ShapeDtypeStruct((Mp, Np), out_dtype),
        grid_spec=pltpu.PrefetchScalarGridSpec(
            num_scalar_prefetch=0,
            grid=grid,
            in_specs=[
                pl.BlockSpec((tm, tk), lambda i, j, k: (i, k)),   # activations
                w_spec,                                           # weight (OUT, IN)
                pl.BlockSpec((1, tn), lambda i, j, k: (0, j)),    # bias
            ],
            out_specs=pl.BlockSpec((tm, tn), lambda i, j, k: (i, j)),
            scratch_shapes=scratch,
        ),
        compiler_params=pltpu.CompilerParams(
            # M/N shard across TensorCores (v7x megacore); K is the reduction.
            dimension_semantics=("parallel", "parallel", "arbitrary"),
            vmem_limit_bytes=vmem_limit,
        ),
        cost_estimate=cost,
    )(xp, wp, bp)

    if Mp != B or Np != OUT:
        out = out[:B, :OUT]
    return out


def _check(key, batch, in_features, out_features, *, tol,
           param_dtype=jnp.float32, compute_dtype=jnp.bfloat16, **tile_kw):
    k_x, k_w, k_b = jax.random.split(key, 3)
    bound = 1.0 / (in_features ** 0.5)
    weight = jax.random.uniform(k_w, (out_features, in_features),
                                minval=-bound, maxval=bound,
                                dtype=jnp.float32).astype(param_dtype)
    bias = jax.random.uniform(k_b, (out_features,),
                              minval=-bound, maxval=bound, dtype=jnp.float32)
    x = jax.random.normal(k_x, (batch, in_features),
                          dtype=jnp.float32).astype(param_dtype)

    y = fc_forward(x, weight, bias, compute_dtype=compute_dtype, **tile_kw)
    jax.block_until_ready(y)

    y_ref = jnp.dot(x.astype(jnp.float32), weight.astype(jnp.float32).T,
                    precision=jax.lax.Precision.HIGHEST) + bias
    assert y.shape == (batch, out_features)
    y32 = y.astype(jnp.float32)
    err = jnp.max(jnp.abs(y32 - y_ref))
    assert jnp.allclose(y32, y_ref, atol=tol, rtol=tol), (
        f"mismatch: max abs err {err}")


if __name__ == "__main__":
    key = jax.random.PRNGKey(0)
    k1, k2, k3 = jax.random.split(key, 3)

    # Small shape matching the module spec (single-tile path, minimal padding,
    # f32 output -> accumulate-into-output kernel).
    _check(k1, batch=8, in_features=32, out_features=64, tol=2e-2)

    # IN=640: no K rounding to 1024 anymore (tk=640), N split across two
    # blocks so a v7x second core would get work.
    _check(k2, batch=16, in_features=640, out_features=256, tol=2e-2)

    # bf16 params/output + forced small tiles to exercise the multi-step K
    # accumulation, the f32-scratch finalize path and Buffered(3) weights.
    _check(k3, batch=16, in_features=512, out_features=256, tol=2e-2,
           param_dtype=jnp.bfloat16, max_tm=16, max_tn=128, max_tk=128)

    print("KERNEL_OK")
</pallas_src>

<mosaic_0001>
module attributes {stable_mosaic.version = 11 : i64} {
  func.func @_fc_kernel_f32_out(%arg0: i32, %arg1: i32, %arg2: i32, %arg3: memref<16x128xf32, #tpu.memory_space<vmem>>, %arg4: memref<128x128xf32, #tpu.memory_space<vmem>>, %arg5: memref<1x128xf32, #tpu.memory_space<vmem>>, %arg6: memref<16x128xf32, #tpu.memory_space<vmem>>) attributes {dimension_semantics = [#tpu.dimension_semantics<parallel>, #tpu.dimension_semantics<parallel>, #tpu.dimension_semantics<arbitrary>], iteration_bounds = array<i64: 1, 1, 1>, scalar_prefetch = 0 : i64, scratch_operands = 0 : i64, tpu.core_type = #tpu.core_type<tc>, window_params = [{transform_indices = @transform_0, window_bounds = array<i64: 16, 128>}, {transform_indices = @transform_1, window_bounds = array<i64: 128, 128>}, {transform_indices = @transform_2, window_bounds = array<i64: 1, 128>}, {transform_indices = @transform_3, window_bounds = array<i64: 16, 128>}]} {
    %c0_i32 = arith.constant 0 : i32
    %0 = arith.cmpi eq, %arg2, %c0_i32 : i32
    %1 = arith.extui %0 : i1 to i32
    %c0_i32_0 = arith.constant 0 : i32
    %2 = arith.cmpi ne, %1, %c0_i32_0 : i32
    scf.if %2 {
      %cst_10 = arith.constant 0.000000e+00 : f32
      %14 = vector.broadcast %cst_10 : f32 to vector<16x128xf32>
      %c0_11 = arith.constant 0 : index
      %c0_12 = arith.constant 0 : index
      %15 = vector.load %arg6[%c0_11, %c0_12] : memref<16x128xf32, #tpu.memory_space<vmem>>, vector<16x128xf32>
      tpu.vector_store %arg6[%c0_11, %c0_12], %14 {strides = array<i32>} : memref<16x128xf32, #tpu.memory_space<vmem>>, vector<16x128xf32>,
    } else {
    }
    %c0 = arith.constant 0 : index
    %c0_1 = arith.constant 0 : index
    %3 = vector.load %arg6[%c0, %c0_1] : memref<16x128xf32, #tpu.memory_space<vmem>>, vector<16x128xf32>
    %c0_2 = arith.constant 0 : index
    %c0_3 = arith.constant 0 : index
    %4 = vector.load %arg3[%c0_2, %c0_3] : memref<16x128xf32, #tpu.memory_space<vmem>>, vector<16x128xf32>
    %5 = arith.truncf %4 : vector<16x128xf32> to vector<16x128xbf16>
    %c0_4 = arith.constant 0 : index
    %c0_5 = arith.constant 0 : index
    %6 = vector.load %arg4[%c0_4, %c0_5] : memref<128x128xf32, #tpu.memory_space<vmem>>, vector<128x128xf32>
    %7 = arith.truncf %6 : vector<128x128xf32> to vector<128x128xbf16>
    %cst = arith.constant dense<0.000000e+00> : vector<16x128xf32>
    %8 = tpu.matmul %5, %7, %cst {dimension_numbers = #tpu.dot_dimension_numbers<[1], [1], [0], [0], [0, 0, 1, 0], [], []>} : vector<16x128xbf16>, vector<128x128xbf16>, vector<16x128xf32> -> vector<16x128xf32>
    %9 = arith.addf %3, %8 : vector<16x128xf32>
    %c0_6 = arith.constant 0 : index
    %c0_7 = arith.constant 0 : index
    %10 = vector.load %arg6[%c0_6, %c0_7] : memref<16x128xf32, #tpu.memory_space<vmem>>, vector<16x128xf32>
    tpu.vector_store %arg6[%c0_6, %c0_7], %9 {strides = array<i32>} : memref<16x128xf32, #tpu.memory_space<vmem>>, vector<16x128xf32>,
    %c0_i32_8 = arith.constant 0 : i32
    %11 = arith.cmpi eq, %arg2, %c0_i32_8 : i32
    %12 = arith.extui %11 : i1 to i32
    %c0_i32_9 = arith.constant 0 : i32
    %13 = arith.cmpi ne, %12, %c0_i32_9 : i32
    scf.if %13 {
      %c0_10 = arith.constant 0 : index
      %c0_11 = arith.constant 0 : index
      %14 = vector.load %arg6[%c0_10, %c0_11] : memref<16x128xf32, #tpu.memory_space<vmem>>, vector<16x128xf32>
      %c0_12 = arith.constant 0 : index
      %c0_13 = arith.constant 0 : index
      %15 = vector.load %arg5[%c0_12, %c0_13] : memref<1x128xf32, #tpu.memory_space<vmem>>, vector<1x128xf32>
      %16 = vector.broadcast %15 : vector<1x128xf32> to vector<16x128xf32>
      %17 = arith.addf %14, %16 : vector<16x128xf32>
      %c0_14 = arith.constant 0 : index
      %c0_15 = arith.constant 0 : index
      %18 = vector.load %arg6[%c0_14, %c0_15] : memref<16x128xf32, #tpu.memory_space<vmem>>, vector<16x128xf32>
      tpu.vector_store %arg6[%c0_14, %c0_15], %17 {strides = array<i32>} : memref<16x128xf32, #tpu.memory_space<vmem>>, vector<16x128xf32>,
    } else {
    }
    return
  }
  func.func @transform_0(%arg0: i32, %arg1: i32, %arg2: i32) -> (i32, i32) {
    %c0_i32 = arith.constant 0 : i32
    return %arg0, %arg2 : i32, i32
  }
  func.func @transform_1(%arg0: i32, %arg1: i32, %arg2: i32) -> (i32, i32) {
    %c0_i32 = arith.constant 0 : i32
    return %arg1, %arg2 : i32, i32
  }
  func.func @transform_2(%arg0: i32, %arg1: i32, %arg2: i32) -> (i32, i32) {
    %c0_i32 = arith.constant 0 : i32
    %c0_i32_0 = arith.constant 0 : i32
    return %c0_i32, %arg1 : i32, i32
  }
  func.func @transform_3(%arg0: i32, %arg1: i32, %arg2: i32) -> (i32, i32) {
    %c0_i32 = arith.constant 0 : i32
    return %arg0, %arg1 : i32, i32
  }
}

</mosaic_0001>

<bundles_post_ra>
// kernel: tpu_custom_call.1
= control target key start
LH: loop header
LB: loop body
LE: loop exit
PB: predicated region body
PF: predicated region fallthrough
CT: control target
= control target key end

     0   :  { %8 = vsyncpa [#allocation3], 0  ;;  %s264_s0 = inlined_call_operand.hbm [shape: f32[16,128], index: 0, kind: input, shape index: {}]   ;;  %s265_s1 = inlined_call_operand.hbm [shape: f32[128,128], index: 1, kind: input, shape index: {}]   ;;  %s266_s2 = inlined_call_operand.vmem [shape: f32[1,128], index: 2, kind: input, shape index: {}]   ;;  %s267_s3 = inlined_call_operand.hbm [shape: f32[16,128], index: 3, kind: output, shape index: {}]  }
   0x1   :  { %9 = vsyncpa [#allocation6], 0 }
   0x2   :  { %10 = vsyncpa [#allocation4], 0  ;;  %s15_s14 = sshll.u32 %s264_s0, 4  ;;  %s218_s15 = smov [#allocation2]   ;;  %s16_s14 = int_to_ptr.hbm [resolvable:$true] %s15_s14 }
   0x3   :  { %s17_s16 = sshll.u32 %s218_s15, 4  ;;  %s28_s19 = sshll.u32 %s265_s1, 4  ;;  %s18_s16 = int_to_ptr.vmem [resolvable:$true] %s17_s16  ;;  %s29_s19 = int_to_ptr.hbm [resolvable:$true] %s28_s19 }
   0x4   :  { %s219_s20 = smov 128   ;;  %s220_s21 = smov 8  }
   0x5   :  { %23 = dma.hbm_to_vmem [thread:$0]  %s16_s14, 256, %s18_s16, [#allocation3], %s219_s20, %s219_s20, %s220_s21  }
   0x6   :  { %s221_s22 = smov [#allocation5]  }
   0x7   :  { %s30_s23 = sshll.u32 %s221_s22, 4  ;;  %s31_s23 = int_to_ptr.vmem [resolvable:$true] %s30_s23 }
   0x8   :  { %36 = dma.hbm_to_vmem [thread:$0]  %s29_s19, 2048, %s31_s23, [#allocation6], %s219_s20, %s219_s20, %s220_s21  }
   0x9   :  { %212 = dma.done.wait [#allocation3], 256  }
   0xa   :  { %213 = vsyncadd [#allocation3], 4294967040 }
   0xb   :  { %214 = dma.done.wait [#allocation6], 2048  }
   0xc   :  { %215 = vsyncadd [#allocation6], 4294965248  ;;  %v72_v0 = vld [vmem:[#allocation5 + $0x70] sm:$0xff]  ;;  %v73_v1 = vld [vmem:[#allocation5 + $0x78] sm:$0xff]  ;;  %s222_s24 = smov [#allocation7]   ;;  %s119_s28 = sshll.u32 %s267_s3, 4  ;;  %s120_s28 = int_to_ptr.hbm [resolvable:$true] %s119_s28 }
   0xd   :  { %v81_v2 = vpack.c.bf16 %v73_v1, %v72_v0  ;;  %v70_v3 = vld [vmem:[#allocation5 + $0x60] sm:$0xff]  ;;  %v71_v4 = vld [vmem:[#allocation5 + $0x68] sm:$0xff]  ;;  %v68_v6 = vld [vmem:[#allocation5 + $0x50] sm:$0xff]  ;;  %s117_s25 = sshll.u32 %s222_s24, 4  ;;  %s118_s25 = int_to_ptr.vmem [resolvable:$true] %s117_s25 }
   0xe   :  { %v80_v5 = vpack.c.bf16 %v71_v4, %v70_v3  ;;  %v69_v7 = vld [vmem:[#allocation5 + $0x58] sm:$0xff]  ;;  %v66_v9 = vld [vmem:[#allocation5 + $0x40] sm:$0xff]  ;;  %v67_v10 = vld [vmem:[#allocation5 + $0x48] sm:$0xff] }
   0xf   :  { %82 = vmatpush.bf16.xpose.msra.mxu0 %v81_v2  ;;  %v79_v8 = vpack.c.bf16 %v69_v7, %v68_v6  ;;  %v78_v11 = vpack.c.bf16 %v67_v10, %v66_v9  ;;  %v64_v12 = vld [vmem:[#allocation5 + $0x30] sm:$0xff]  ;;  %v65_v13 = vld [vmem:[#allocation5 + $0x38] sm:$0xff]  ;;  %v62_v15 = vld [vmem:[#allocation5 + $0x20] sm:$0xff] }
  0x10   :  { %v77_v14 = vpack.c.bf16 %v65_v13, %v64_v12  ;;  %v63_v16 = vld [vmem:[#allocation5 + $0x28] sm:$0xff]  ;;  %v60_v18 = vld [vmem:[#allocation5 + $0x10] sm:$0xff]  ;;  %v61_v19 = vld [vmem:[#allocation5 + $0x18] sm:$0xff] }
  0x11   :  { %v76_v17 = vpack.c.bf16 %v63_v16, %v62_v15  ;;  %v75_v20 = vpack.c.bf16 %v61_v19, %v60_v18  ;;  %v58_v21 = vld [vmem:[#allocation5] sm:$0xff]  ;;  %v59_v22 = vld [vmem:[#allocation5 + $0x8] sm:$0xff]  ;;  %v55_v24 = vld [vmem:[#allocation2] sm:$0xff] }
  0x12   :  { %v74_v23 = vpack.c.bf16 %v59_v22, %v58_v21  ;;  %v56_v25 = vld [vmem:[#allocation2 + $0x8] sm:$0xff]  ;;  %v139_v27 = vld [vmem:[%s266_s2] ss:$0 sm:$0xff] }
  0x13   :  { %v57_v26 = vpack.c.bf16 %v56_v25, %v55_v24 }
  0x17   :  { %83 = vmatpush.bf16.xpose.msra.mxu0 %v80_v5 }
  0x1f   :  { %84 = vmatpush.bf16.xpose.msra.mxu0 %v79_v8 }
  0x27   :  { %85 = vmatpush.bf16.xpose.msra.mxu0 %v78_v11 }
  0x2f   :  { %86 = vmatpush.bf16.xpose.msra.mxu0 %v77_v14 }
  0x37   :  { %87 = vmatpush.bf16.xpose.msra.mxu0 %v76_v17 }
  0x3f   :  { %88 = vmatpush.bf16.xpose.msra.mxu0 %v75_v20 }
  0x47   :  { %89 = vmatpush.bf16.xpose.msra.mxu0 %v74_v23 }
  0x4e   :  { %90 = vmatmul.bf16.vlgmr.msra.gmra.mxu0 %v57_v26 }
  0xcb   :  { %v91_v28 = vpop.f32.mrf.mxu0 }
  0xcc   :  { %v109_v29 = vadd.f32 %v139_v27, %v91_v28 }
  0xce   :  { %111 = vst [vmem:[#allocation7] sm:$0xff] %v109_v29 }
  0xd3   :  { %v93_v30 = vpop.f32.mrf.mxu0 }
  0xd4   :  { %v110_v31 = vadd.f32 %v139_v27, %v93_v30 }
  0xd6   :  { %112 = vst [vmem:[#allocation7 + $0x8] sm:$0xff] %v110_v31 }
  0xd7   :  { %125 = dma.vmem_to_hbm [thread:$0]  %s118_s25, 256, %s120_s28, [#allocation4], %s219_s20, %s219_s20, %s220_s21  }
  0xd8   :  { %216 = dma.done.wait [#allocation4], 256  }
  0xd9   :  { %217 = vsyncadd [#allocation4], 4294967040 }
  0xda   :  { %130 = vsyncpa [#allocation3], 1 }
  0xdb   :  { %131 = vsyncpa [#allocation6], 1 }
  0xdc   :  { %132 = vsyncpa [#allocation4], 1 }

</bundles_post_ra>
